<compile_context>
chip_gen: v5e
topology: v5e:2x2
jax: 0.10.0
libtpu: 0.0.40
codegen_flags: <defaults>
</compile_context>

<pallas_src>
import jax
import jax.numpy as jnp
from jax.experimental import pallas as pl
from jax.experimental.pallas import tpu as pltpu

GN_EPS = 1e-5
T0, T1 = 0.0, 10.0


def _add_kernel(x_ref, d_ref, o_ref):
    # Pure memory-bound add: o = x + (T1 - T0) * relu(beta2), with the RHS
    # constant precomputed in the wrapper.  d_ref broadcasts over rows when it
    # is a (1, lanes) block.
    o_ref[...] = (x_ref[...] + d_ref[...]).astype(o_ref.dtype)


def _pick_row_tile(rows):
    """Largest multiple-of-8 divisor of `rows` (<= 1024 rows / ~512 KiB f32
    block) that still leaves at least 2 grid steps when rows >= 16, so the
    single 'parallel' grid axis shards across both v7x TensorCores."""
    if rows % 8 != 0:
        return rows  # full-extent block is always legal
    best = 8
    for cand in range(8, min(rows, 1024) + 1, 8):
        if rows % cand != 0:
            continue
        if rows >= 16 and rows // cand < 2:
            continue
        best = cand
    return best


def odenet_forward(x, params):
    """x: (B, N) float32.  params: dict of ODEFunc parameters.

    Only beta2 (GroupNorm2 shift) survives the exact algebraic simplification;
    all other parameters are mathematically dead (multiplied by an exact zero)
    and are neither DMA'd nor touched by the kernel.
    """
    B, N = x.shape
    delta = ((T1 - T0) * jnp.maximum(params["be2"], 0.0)).astype(jnp.float32)  # (N,)

    # Present a lane-dense (rows, 128) slab whenever possible so stores are
    # unmasked full-lane vst; otherwise fall back to the natural (B, N) view.
    if N % 128 == 0:
        rows, lanes = B, N
        x2 = x
        d2 = delta.reshape(1, N)
    elif (B * N) % 128 == 0:
        rows, lanes = (B * N) // 128, 128
        x2 = x.reshape(rows, lanes)
        if 128 % N == 0:
            # Every slab row is 128//N consecutive feature vectors -> one tiny
            # (1, 128) delta row shared by all grid steps.
            d2 = jnp.tile(delta.reshape(1, N), (1, 128 // N))
        else:
            d2 = jnp.broadcast_to(delta, (B, N)).reshape(rows, lanes)
    else:
        rows, lanes = B, N
        x2 = x
        d2 = delta.reshape(1, N)

    tile_r = _pick_row_tile(rows)
    grid = (pl.cdiv(rows, tile_r),)

    x_spec = pl.BlockSpec((tile_r, lanes), lambda i: (i, 0))
    if d2.shape[0] == 1:
        d_spec = pl.BlockSpec((1, lanes), lambda i: (0, 0))
    else:
        d_spec = pl.BlockSpec((tile_r, lanes), lambda i: (i, 0))

    # Memory-bound: one add per element; read x + delta, write out.
    cost = pl.CostEstimate(
        flops=rows * lanes,
        transcendentals=0,
        bytes_accessed=4 * (2 * rows * lanes + d2.size * grid[0]),
    )

    out2 = pl.pallas_call(
        _add_kernel,
        out_shape=jax.ShapeDtypeStruct((rows, lanes), jnp.float32),
        grid=grid,
        in_specs=[x_spec, d_spec],
        out_specs=x_spec,
        compiler_params=pltpu.CompilerParams(
            dimension_semantics=("parallel",)),
        cost_estimate=cost,
    )(x2, d2)

    return out2.reshape(B, N)


def make_params(key, N):
    """Deterministic synthetic parameters matching ODEFunc's shapes."""
    ks = jax.random.split(key, 8)
    bound = 1.0 / jnp.sqrt(N)
    u = lambda k, shape: jax.random.uniform(k, shape, jnp.float32, -bound, bound)
    return {
        "w1": u(ks[0], (N, N)),   # fcc1.weight
        "b1": u(ks[1], (N,)),     # fcc1.bias
        "w2": u(ks[2], (N, N)),   # fcc2.weight
        "b2": u(ks[3], (N,)),     # fcc2.bias
        # GroupNorm affine params (PyTorch defaults are ones/zeros; random
        # deterministic values make the computation non-trivial).
        "g1": 1.0 + 0.1 * jax.random.normal(ks[4], (N,), jnp.float32),
        "be1": 0.1 * jax.random.normal(ks[5], (N,), jnp.float32),
        "g2": 1.0 + 0.1 * jax.random.normal(ks[6], (N,), jnp.float32),
        "be2": 0.1 * jax.random.normal(ks[7], (N,), jnp.float32),
    }


if __name__ == "__main__":
    B, N = 8, 32
    key = jax.random.PRNGKey(0)
    kx, kp = jax.random.split(key)
    x = jax.random.normal(kx, (B, N), jnp.float32)
    params = make_params(kp, N)

    out = jax.block_until_ready(odenet_forward(x, params))

    # Reference in plain JAX: the literal ODEFunc (Linear -> per-channel
    # GroupNorm -> ReLU, twice) integrated with fixed-step RK4 over [0, 10].
    # Because the RHS is constant in (t, y), any consistent integrator agrees
    # with the kernel's closed form x + (T1 - T0) * relu(beta2).
    def group_norm_per_channel(h, gamma, beta):
        mean = h                      # each group holds exactly one element
        var = jnp.zeros_like(h)
        return (h - mean) / jnp.sqrt(var + GN_EPS) * gamma + beta

    def ode_func_ref(y):
        h = y @ params["w1"].T + params["b1"]
        h = group_norm_per_channel(h, params["g1"], params["be1"])
        h = jnp.maximum(h, 0.0)
        h = h @ params["w2"].T + params["b2"]
        h = group_norm_per_channel(h, params["g2"], params["be2"])
        h = jnp.maximum(h, 0.0)
        return h

    num_steps = 32
    dt = (T1 - T0) / num_steps
    y = x
    for _ in range(num_steps):
        k1 = ode_func_ref(y)
        k2 = ode_func_ref(y + 0.5 * dt * k1)
        k3 = ode_func_ref(y + 0.5 * dt * k2)
        k4 = ode_func_ref(y + dt * k3)
        y = y + (dt / 6.0) * (k1 + 2 * k2 + 2 * k3 + k4)

    assert out.shape == (B, N)
    assert jnp.allclose(out, y, atol=1e-4, rtol=1e-4)
    assert jnp.allclose(
        out, x + (T1 - T0) * jnp.maximum(params["be2"], 0.0),
        atol=1e-5, rtol=1e-5)
    print("KERNEL_OK")
</pallas_src>

<mosaic_0001>
module attributes {stable_mosaic.version = 11 : i64} {
  func.func @_add_kernel(%arg0: i32, %arg1: memref<2x128xf32, #tpu.memory_space<vmem>>, %arg2: memref<1x128xf32, #tpu.memory_space<vmem>>, %arg3: memref<2x128xf32, #tpu.memory_space<vmem>>) attributes {dimension_semantics = [#tpu.dimension_semantics<parallel>], iteration_bounds = array<i64: 1>, scalar_prefetch = 0 : i64, scratch_operands = 0 : i64, tpu.core_type = #tpu.core_type<tc>, window_params = [{transform_indices = @transform_0, window_bounds = array<i64: 2, 128>}, {pipeline_mode = #tpu.pipeline_mode<synchronous>, transform_indices = @transform_1, window_bounds = array<i64: 1, 128>}, {transform_indices = @transform_2, window_bounds = array<i64: 2, 128>}]} {
    %c0 = arith.constant 0 : index
    %c0_0 = arith.constant 0 : index
    %0 = vector.load %arg1[%c0, %c0_0] : memref<2x128xf32, #tpu.memory_space<vmem>>, vector<2x128xf32>
    %c0_1 = arith.constant 0 : index
    %c0_2 = arith.constant 0 : index
    %1 = vector.load %arg2[%c0_1, %c0_2] : memref<1x128xf32, #tpu.memory_space<vmem>>, vector<1x128xf32>
    %2 = vector.broadcast %1 : vector<1x128xf32> to vector<2x128xf32>
    %3 = arith.addf %0, %2 : vector<2x128xf32>
    %c0_3 = arith.constant 0 : index
    %c0_4 = arith.constant 0 : index
    %4 = vector.load %arg3[%c0_3, %c0_4] : memref<2x128xf32, #tpu.memory_space<vmem>>, vector<2x128xf32>
    tpu.vector_store %arg3[%c0_3, %c0_4], %3 {strides = array<i32>} : memref<2x128xf32, #tpu.memory_space<vmem>>, vector<2x128xf32>,
    return
  }
  func.func @transform_0(%arg0: i32) -> (i32, i32) {
    %c0_i32 = arith.constant 0 : i32
    %c0_i32_0 = arith.constant 0 : i32
    return %arg0, %c0_i32 : i32, i32
  }
  func.func @transform_1(%arg0: i32) -> (i32, i32) {
    %c0_i32 = arith.constant 0 : i32
    %c0_i32_0 = arith.constant 0 : i32
    %c0_i32_1 = arith.constant 0 : i32
    return %c0_i32, %c0_i32_0 : i32, i32
  }
  func.func @transform_2(%arg0: i32) -> (i32, i32) {
    %c0_i32 = arith.constant 0 : i32
    %c0_i32_0 = arith.constant 0 : i32
    return %arg0, %c0_i32 : i32, i32
  }
}

</mosaic_0001>

<bundles_post_ra>
// kernel: tpu_custom_call.1
= control target key start
LH: loop header
LB: loop body
LE: loop exit
PB: predicated region body
PF: predicated region fallthrough
CT: control target
= control target key end

     0   :  { %7 = vsyncpa [#allocation3], 0  ;;  %s174_s0 = inlined_call_operand.hbm [shape: f32[2,128], index: 0, kind: input, shape index: {}]   ;;  %s175_s1 = inlined_call_operand.hbm [shape: f32[1,128], index: 1, kind: input, shape index: {}]   ;;  %s176_s2 = inlined_call_operand.hbm [shape: f32[2,128], index: 2, kind: output, shape index: {}]  }
   0x1   :  { %8 = vsyncpa [#allocation6], 0 }
   0x2   :  { %9 = vsyncpa [#allocation4], 0  ;;  %s15_s11 = sshll.u32 %s174_s0, 4  ;;  %s147_s12 = smov [#allocation2]   ;;  %s16_s11 = int_to_ptr.hbm [resolvable:$true] %s15_s11 }
   0x3   :  { %s17_s13 = sshll.u32 %s147_s12, 4  ;;  %s26_s16 = sshll.u32 %s175_s1, 4  ;;  %s18_s13 = int_to_ptr.vmem [resolvable:$true] %s17_s13  ;;  %s27_s16 = int_to_ptr.hbm [resolvable:$true] %s26_s16 }
   0x4   :  { %20 = dma.hbm_to_vmem [thread:$0]  %s16_s11, 32, %s18_s13, [#allocation3]  }
   0x5   :  { %s148_s17 = smov [#allocation5]  }
   0x6   :  { %s28_s18 = sshll.u32 %s148_s17, 4  ;;  %s29_s18 = int_to_ptr.vmem [resolvable:$true] %s28_s18 }
   0x7   :  { %31 = dma.hbm_to_vmem [thread:$0]  %s27_s16, 16, %s29_s18, [#allocation6]  }
   0x8   :  { %141 = dma.done.wait [#allocation3], 32  }
   0x9   :  { %142 = vsyncadd [#allocation3], 4294967264 }
   0xa   :  { %143 = dma.done.wait [#allocation6], 16  }
   0xb   :  { %144 = vsyncadd [#allocation6], 4294967280  ;;  %s149_s19 = smov [#allocation7]   ;;  %s54_s22 = sshll.u32 %s176_s2, 4  ;;  %v40_v0 = vld [vmem:[#allocation2] sm:$0x3]  ;;  %s55_s22 = int_to_ptr.hbm [resolvable:$true] %s54_s22 }
   0xc   :  { %s52_s0 = sshll.u32 %s149_s19, 4  ;;  %v68_v1 = vld [vmem:[#allocation5] ss:$0 sm:$0xff]  ;;  %s53_s0 = int_to_ptr.vmem [resolvable:$true] %s52_s0 }
   0xd   :  { %v45_v2 = vadd.f32 %v68_v1, %v40_v0 }
   0xf   :  { %46 = vst [vmem:[#allocation7] sm:$0x3] %v45_v2 }
  0x10   :  { %57 = dma.vmem_to_hbm [thread:$0]  %s53_s0, 32, %s55_s22, [#allocation4]  }
  0x11   :  { %145 = dma.done.wait [#allocation4], 32  }
  0x12   :  { %146 = vsyncadd [#allocation4], 4294967264 }
  0x13   :  { %62 = vsyncpa [#allocation3], 1 }
  0x14   :  { %63 = vsyncpa [#allocation6], 1 }
  0x15   :  { %64 = vsyncpa [#allocation4], 1 }

</bundles_post_ra>
